<compile_context>
chip_gen: v5e
topology: v5e:2x2
jax: 0.10.0
libtpu: 0.0.40
codegen_flags: <defaults>
</compile_context>

<pallas_src>
import functools
import math

import jax
import jax.numpy as jnp
import numpy as np
from jax import lax
from jax.experimental import pallas as pl
from jax.experimental.pallas import tpu as pltpu


def _pair(v):
    if isinstance(v, (tuple, list)):
        assert len(v) == 2
        return int(v[0]), int(v[1])
    return int(v), int(v)


def _round_up(x, m):
    return -(-int(x) // int(m)) * int(m)


def _interp_matrix_np(n_in, n_out, k, s, p):
    """(n_out, n_in) f32 linear-interpolation matrix for the transposed-conv grid.

    Output index o samples input coordinate c = (o + p - (k-1)/2) / s (centre of
    the ConvTranspose kernel footprint), linear interpolation, border-clamped.
    Built host-side with numpy (no device scatter ops / extra HBM round trips).
    """
    # TODO(synk): exact boundary / anchor convention of warps.upsample_convlike
    # not verifiable without the learn2synth source; border clamp assumed.
    o = np.arange(n_out, dtype=np.float64)
    c = (o + p - (k - 1) / 2.0) / s
    c = np.clip(c, 0.0, float(n_in - 1))
    i0 = np.floor(c).astype(np.int64)
    w1 = c - i0
    i1 = np.minimum(i0 + 1, n_in - 1)
    W = np.zeros((n_out, n_in), dtype=np.float64)
    rows = np.arange(n_out)
    np.add.at(W, (rows, i0), 1.0 - w1)
    np.add.at(W, (rows, i1), w1)
    return W.astype(np.float32)


def _resample_kernel(x_ref, wwT_ref, bd_ref, o_ref, *, gh, gho, n_groups):
    """One grid step (TN samples as 2-D row blocks).

    x_ref  : (TN*H, W)     input rows (sample-major)
    wwT_ref: (W, Wo)       f32 interpolation weights (W contraction)
    bd_ref : (G*Ho, G*H)   f32 block-diagonal kron(I_G, Wh) (H contraction)
    o_ref  : (TN*Ho, Wo)   output rows
    """
    wwT = wwT_ref[...]
    bd = bd_ref[...]

    def group(g):
        ri = g * gh
        ro = g * gho
        if not isinstance(g, int):
            if gh % 8 == 0:
                ri = pl.multiple_of(ri, 8)
            if gho % 8 == 0:
                ro = pl.multiple_of(ro, 8)
        xg = x_ref[pl.ds(ri, gh), :]
        if xg.dtype != jnp.float32:
            xg = xg.astype(jnp.float32)
        # W contraction: one 2-D MXU matmul, M = G*H.
        t = jnp.dot(xg, wwT, preferred_element_type=jnp.float32)      # (G*H, Wo)
        # H contraction: one 2-D MXU matmul against the block-diagonal weight
        # (no broadcast weight, no per-sample tiny batched matmuls).
        og = jnp.dot(bd, t, preferred_element_type=jnp.float32)       # (G*Ho, Wo)
        o_ref[pl.ds(ro, gho), :] = og.astype(o_ref.dtype)

    if n_groups <= 4:
        for g in range(n_groups):
            group(g)
    else:
        def body(g, carry):
            group(g)
            return carry
        lax.fori_loop(0, n_groups, body, 0)


def _padded_vmem_bytes(rows, cols, itemsize):
    """VMEM footprint of a (rows, cols) array, including (sublane, 128) padding."""
    sub = {4: 8, 2: 16, 1: 32}.get(int(itemsize), 8)
    return _round_up(rows, sub) * _round_up(cols, 128) * int(itemsize)


def _choose_tn(n, unit, per_sample_bytes, block_budget_bytes, min_steps):
    """Samples per grid step: a multiple of `unit` that fits the VMEM block
    budget, keeps >= min_steps grid steps when possible, and prefers an exact
    divisor of n (no padding) when one exists near the target."""
    tn_vmem = (block_budget_bytes // max(1, per_sample_bytes)) // unit * unit
    tn_vmem = max(unit, tn_vmem)
    if n >= min_steps * unit:
        tn_steps = max(unit, (n // (min_steps * unit)) * unit)
    else:
        tn_steps = unit
    tn = max(unit, min(tn_vmem, tn_steps))
    tn = min(tn, _round_up(n, unit))
    cand = tn
    while cand >= max(unit, tn // 2):
        if n % cand == 0:
            return cand
        cand -= unit
    return tn


def upsample_convlike(flow, kernel_size, stride=2, padding=0, shape=None):
    """flow: (B, D, H, W) -> (B, D, Ho, Wo)."""
    B, D, H, W = flow.shape
    kh, kw = _pair(kernel_size)
    sh, sw = _pair(stride)
    ph, pw = _pair(padding)
    if shape is None:
        Ho = (H - 1) * sh - 2 * ph + kh
        Wo = (W - 1) * sw - 2 * pw + kw
    else:
        Ho, Wo = int(shape[0]), int(shape[1])

    N = B * D
    isz = np.dtype(flow.dtype).itemsize

    # Host-side interpolation weights (f32 compute throughout: the kernel is
    # HBM-bound, so the f32 MXU path is hidden and double rounding is avoided).
    Wh = _interp_matrix_np(H, Ho, kh, sh, ph)                           # (Ho, H)
    WwT = np.ascontiguousarray(_interp_matrix_np(W, Wo, kw, sw, pw).T)  # (W, Wo)

    # Group G samples so the H contraction is one block-diagonal 2-D matmul
    # (G*Ho, G*H) @ (G*H, Wo) per group.  G*H ~ 128 keeps a decent MXU shape;
    # the block-diagonal waste factor G only appears when H is small, where
    # compute is negligible anyway.
    G = max(1, -(-128 // H))
    G = min(G, max(1, 2048 // max(1, Ho)))      # bound kron(I_G, Wh) size
    BD = np.kron(np.eye(G, dtype=np.float32), Wh)                       # (G*Ho, G*H)

    # TN must be a multiple of G and keep the 2-D row blocks (TN*H, W) and
    # (TN*Ho, Wo) sublane-aligned (second-minor block dim % 8 == 0).
    a = 8 // math.gcd(8, G * H)
    b = 8 // math.gcd(8, G * Ho)
    unit = G * (a * b // math.gcd(a, b))

    try:
        vmem_cap = int(pltpu.get_tpu_info().vmem_capacity_bytes)
    except Exception:
        vmem_cap = 64 * 1024 * 1024             # conservative (v7x-sized) fallback

    # Per-sample cost of the double-buffered in/out blocks, including the
    # (8,128) lane/sublane padding (for W, Wo < 128 the real VMEM footprint is
    # much larger than the raw bytes — small-spatial regime).
    per_sample = 2 * (_padded_vmem_bytes(H, W, isz) +
                      _padded_vmem_bytes(Ho, Wo, isz))
    # Resident weights (double-buffered) + per-group f32 intermediates + slack.
    fixed = (2 * (_padded_vmem_bytes(W, Wo, 4) +
                  _padded_vmem_bytes(G * Ho, G * H, 4))
             + _padded_vmem_bytes(G * H, W, 4)
             + _padded_vmem_bytes(G * H, Wo, 4)
             + _padded_vmem_bytes(G * Ho, Wo, 4)
             + (1 << 20))

    # Generation-aware block budget: ~35% of physical VMEM (capped at 40 MiB),
    # leaving headroom under the vmem limit (v7x only has 64 MiB per core).
    block_budget = max(per_sample, min(int(0.35 * vmem_cap), 40 << 20) - fixed)
    TN = _choose_tn(N, unit, per_sample, block_budget, min_steps=4)
    Np = _round_up(max(N, TN), TN)
    n_steps = Np // TN
    # TODO(synk): for very large spatial sizes a single group of G samples may
    # exceed the budget; that regime additionally needs an Ho/Wo-blocked grid axis.
    # TODO(synk): for W, Wo << 128 a fully lane-folded (N, H*W) x kron weights
    # formulation would make the stores lane-dense; not implemented here.

    x2 = flow.reshape(N * H, W)
    if Np != N:
        x2 = jnp.concatenate(
            [x2, jnp.zeros(((Np - N) * H, W), dtype=flow.dtype)], axis=0)

    est = fixed + TN * per_sample
    vmem_limit = int(min(int(0.85 * vmem_cap),
                         max(int(1.5 * est) + (8 << 20), 32 << 20)))

    flops = 2 * Np * (H * W * Wo + G * H * Ho * Wo)
    bytes_accessed = Np * (H * W + Ho * Wo) * isz + (W * Wo + G * G * Ho * H) * 4

    kern = functools.partial(_resample_kernel, gh=G * H, gho=G * Ho,
                             n_groups=TN // G)
    out2 = pl.pallas_call(
        kern,
        out_shape=jax.ShapeDtypeStruct((Np * Ho, Wo), flow.dtype),
        grid=(n_steps,),
        in_specs=[
            pl.BlockSpec((TN * H, W), lambda n: (n, 0)),
            pl.BlockSpec((W, Wo), lambda n: (0, 0)),
            pl.BlockSpec((G * Ho, G * H), lambda n: (0, 0)),
        ],
        out_specs=pl.BlockSpec((TN * Ho, Wo), lambda n: (n, 0)),
        compiler_params=pltpu.CompilerParams(
            dimension_semantics=("parallel",),
            vmem_limit_bytes=vmem_limit),
        cost_estimate=pl.CostEstimate(flops=flops, transcendentals=0,
                                      bytes_accessed=bytes_accessed),
    )(x2, jnp.asarray(WwT), jnp.asarray(BD))

    out = out2.reshape(Np, Ho, Wo)
    if Np != N:
        out = out[:N]
    return out.reshape(B, D, Ho, Wo)


class UpsampleConvLike:
    """Upsample an image the same way a transposed convolution would."""

    def __init__(self, kernel_size, stride=2, padding=0):
        self.kernel_size = kernel_size
        self.stride = stride
        self.padding = padding

    def __call__(self, flow, shape=None):
        return upsample_convlike(flow, self.kernel_size, self.stride,
                                 self.padding, shape)


if __name__ == "__main__":
    key = jax.random.PRNGKey(0)
    B, D, H, W = 2, 4, 16, 16
    ks, st, pd = 4, 2, 1
    flow = jax.random.normal(key, (B, D, H, W), dtype=jnp.float32)

    mod = UpsampleConvLike(ks, stride=st, padding=pd)
    out = jax.block_until_ready(mod(flow))

    Ho = (H - 1) * st - 2 * pd + ks
    Wo = (W - 1) * st - 2 * pd + ks
    assert out.shape == (B, D, Ho, Wo), out.shape

    # Pure-JAX reference (same separable-interpolation math) for a sanity check.
    Wh_ref = jnp.asarray(_interp_matrix_np(H, Ho, ks, st, pd))
    Ww_ref = jnp.asarray(_interp_matrix_np(W, Wo, ks, st, pd))
    ref = jnp.einsum("oh,bdhw,pw->bdop", Wh_ref, flow, Ww_ref)
    assert jnp.allclose(out, ref, atol=1e-5, rtol=1e-5), \
        float(jnp.max(jnp.abs(out - ref)))

    print("KERNEL_OK")
</pallas_src>

<mosaic_0001>
module attributes {stable_mosaic.version = 11 : i64} {
  func.func @_resample_kernel(%arg0: i32, %arg1: memref<128x16xf32, #tpu.memory_space<vmem>>, %arg2: memref<16x32xf32, #tpu.memory_space<vmem>>, %arg3: memref<256x128xf32, #tpu.memory_space<vmem>>, %arg4: memref<256x32xf32, #tpu.memory_space<vmem>>) attributes {dimension_semantics = [#tpu.dimension_semantics<parallel>], iteration_bounds = array<i64: 1>, scalar_prefetch = 0 : i64, scratch_operands = 0 : i64, tpu.core_type = #tpu.core_type<tc>, window_params = [{transform_indices = @transform_0, window_bounds = array<i64: 128, 16>}, {pipeline_mode = #tpu.pipeline_mode<synchronous>, transform_indices = @transform_1, window_bounds = array<i64: 16, 32>}, {pipeline_mode = #tpu.pipeline_mode<synchronous>, transform_indices = @transform_2, window_bounds = array<i64: 256, 128>}, {transform_indices = @transform_3, window_bounds = array<i64: 256, 32>}]} {
    %c0 = arith.constant 0 : index
    %c0_0 = arith.constant 0 : index
    %0 = vector.load %arg2[%c0, %c0_0] : memref<16x32xf32, #tpu.memory_space<vmem>>, vector<16x32xf32>
    %c0_1 = arith.constant 0 : index
    %c0_2 = arith.constant 0 : index
    %1 = vector.load %arg3[%c0_1, %c0_2] : memref<256x128xf32, #tpu.memory_space<vmem>>, vector<256x128xf32>
    %c0_3 = arith.constant 0 : index
    %c0_4 = arith.constant 0 : index
    %2 = vector.load %arg1[%c0_3, %c0_4] : memref<128x16xf32, #tpu.memory_space<vmem>>, vector<128x16xf32>
    %cst = arith.constant dense<0.000000e+00> : vector<128x32xf32>
    %3 = tpu.matmul %2, %0, %cst {dimension_numbers = #tpu.dot_dimension_numbers<[1], [0], [0], [1], [0, 0, 1, 1], [], []>} : vector<128x16xf32>, vector<16x32xf32>, vector<128x32xf32> -> vector<128x32xf32>
    %cst_5 = arith.constant dense<0.000000e+00> : vector<256x32xf32>
    %4 = tpu.matmul %1, %3, %cst_5 {dimension_numbers = #tpu.dot_dimension_numbers<[1], [0], [0], [1], [0, 0, 1, 1], [], []>} : vector<256x128xf32>, vector<128x32xf32>, vector<256x32xf32> -> vector<256x32xf32>
    %c0_6 = arith.constant 0 : index
    %c0_7 = arith.constant 0 : index
    %5 = vector.load %arg4[%c0_6, %c0_7] : memref<256x32xf32, #tpu.memory_space<vmem>>, vector<256x32xf32>
    tpu.vector_store %arg4[%c0_6, %c0_7], %4 {strides = array<i32>} : memref<256x32xf32, #tpu.memory_space<vmem>>, vector<256x32xf32>,
    return
  }
  func.func @transform_0(%arg0: i32) -> (i32, i32) {
    %c0_i32 = arith.constant 0 : i32
    %c0_i32_0 = arith.constant 0 : i32
    return %arg0, %c0_i32 : i32, i32
  }
  func.func @transform_1(%arg0: i32) -> (i32, i32) {
    %c0_i32 = arith.constant 0 : i32
    %c0_i32_0 = arith.constant 0 : i32
    %c0_i32_1 = arith.constant 0 : i32
    return %c0_i32, %c0_i32_0 : i32, i32
  }
  func.func @transform_2(%arg0: i32) -> (i32, i32) {
    %c0_i32 = arith.constant 0 : i32
    %c0_i32_0 = arith.constant 0 : i32
    %c0_i32_1 = arith.constant 0 : i32
    return %c0_i32, %c0_i32_0 : i32, i32
  }
  func.func @transform_3(%arg0: i32) -> (i32, i32) {
    %c0_i32 = arith.constant 0 : i32
    %c0_i32_0 = arith.constant 0 : i32
    return %arg0, %c0_i32 : i32, i32
  }
}

</mosaic_0001>

<bundles_post_ra>
// kernel: tpu_custom_call.1
= control target key start
LH: loop header
LB: loop body
LE: loop exit
PB: predicated region body
PF: predicated region fallthrough
CT: control target
= control target key end

     0   :  { %8 = vsyncpa [#allocation3], 0  ;;  %s422_s15 = smov [#allocation2]   ;;  %s423_s17 = smov 128   ;;  %s651_s0 = inlined_call_operand.vmem [shape: f32[128,16], index: 0, kind: input, shape index: {}]   ;;  %s652_s1 = inlined_call_operand.vmem [shape: f32[16,32], index: 1, kind: input, shape index: {}]   ;;  %s653_s2 = inlined_call_operand.hbm [shape: f32[256,128], index: 2, kind: input, shape index: {}]   ;;  %s654_s3 = inlined_call_operand.vmem [shape: f32[256,32], index: 3, kind: output, shape index: {}]  }
   0x1   :  { %s17_s14 = sshll.u32 %s653_s2, 4  ;;  %s19_s16 = sshll.u32 %s422_s15, 4  ;;  %s18_s14 = int_to_ptr.hbm [resolvable:$true] %s17_s14  ;;  %s20_s16 = int_to_ptr.vmem [resolvable:$true] %s19_s16 }
   0x2   :  { %s424_s18 = smov 8  }
   0x3   :  { %25 = dma.hbm_to_vmem [thread:$0]  %s18_s14, 4096, %s20_s16, [#allocation3], %s423_s17, %s423_s17, %s424_s18  }
   0x4   :  { %420 = dma.done.wait [#allocation3], 4096  }
   0x5   :  { %421 = vsyncadd [#allocation3], 4294963200  ;;  %v31_v0 = vld [vmem:[%s652_s1 + $0x8] sm:$0xff]  ;;  %v30_v1 = vld [vmem:[%s652_s1] sm:$0xff]  ;;  %vm80_vm0 = vcmask 130048   ;;  %vm307_vm1 = vcmask 261120  }
   0x6   :  { %143 = vmatpush.msra.mxu0 %v31_v0  ;;  %v64_v2 = vld [vmem:[%s651_s0] sm:$0xff]  ;;  %v65_v3 = vld [vmem:[%s651_s0 + $0x8] sm:$0xff]  ;;  %v66_v4 = vld [vmem:[%s651_s0 + $0x10] sm:$0xff] }
   0x7   :  { %v67_v5 = vld [vmem:[%s651_s0 + $0x18] sm:$0xff]  ;;  %v68_v6 = vld [vmem:[%s651_s0 + $0x20] sm:$0xff]  ;;  %v69_v7 = vld [vmem:[%s651_s0 + $0x28] sm:$0xff] }
   0x8   :  { %144 = vmatpush.msra.mxu0 %v30_v1  ;;  %v70_v8 = vld [vmem:[%s651_s0 + $0x30] sm:$0xff]  ;;  %v71_v9 = vld [vmem:[%s651_s0 + $0x38] sm:$0xff]  ;;  %v72_v10 = vld [vmem:[%s651_s0 + $0x40] sm:$0xff] }
   0x9   :  { %345 = vmatmul.msk.f32.vlgmr.msra.gmra.mxu0 %vm80_vm0, %v64_v2  ;;  %v73_v11 = vld [vmem:[%s651_s0 + $0x48] sm:$0xff]  ;;  %v74_v12 = vld [vmem:[%s651_s0 + $0x50] sm:$0xff]  ;;  %v75_v13 = vld [vmem:[%s651_s0 + $0x58] sm:$0xff] }
   0xa   :  { %v76_v14 = vld [vmem:[%s651_s0 + $0x60] sm:$0xff]  ;;  %v77_v15 = vld [vmem:[%s651_s0 + $0x68] sm:$0xff]  ;;  %v78_v16 = vld [vmem:[%s651_s0 + $0x70] sm:$0xff] }
   0xb   :  { %v79_v17 = vld [vmem:[%s651_s0 + $0x78] sm:$0xff]  ;;  %v32_v35 = vld [vmem:[#allocation2] sm:$0xff]  ;;  %v33_v38 = vld [vmem:[#allocation2 + $0x8] sm:$0xff] }
   0xc   :  { %v43_v34 = vld [vmem:[#allocation2 + $0x58] sm:$0xff]  ;;  %v44_v37 = vld [vmem:[#allocation2 + $0x60] sm:$0xff]  ;;  %v45_v40 = vld [vmem:[#allocation2 + $0x68] sm:$0xff] }
   0xd   :  { %v55_v36 = vld [vmem:[#allocation2 + $0xb8] sm:$0xff]  ;;  %v56_v39 = vld [vmem:[#allocation2 + $0xc0] sm:$0xff]  ;;  %v34_v41 = vld [vmem:[#allocation2 + $0x10] sm:$0xff] }
   0xe   :  { %v57_v42 = vld [vmem:[#allocation2 + $0xc8] sm:$0xff]  ;;  %v46_v43 = vld [vmem:[#allocation2 + $0x70] sm:$0xff]  ;;  %v35_v44 = vld [vmem:[#allocation2 + $0x18] sm:$0xff] }
   0xf   :  { %v58_v45 = vld [vmem:[#allocation2 + $0xd0] sm:$0xff]  ;;  %v47_v46 = vld [vmem:[#allocation2 + $0x78] sm:$0xff]  ;;  %v36_v47 = vld [vmem:[#allocation2 + $0x20] sm:$0xff] }
  0x10   :  { %v59_v48 = vld [vmem:[#allocation2 + $0xd8] sm:$0xff]  ;;  %v48_v49 = vld [vmem:[#allocation2 + $0x80] sm:$0xff]  ;;  %v37_v50 = vld [vmem:[#allocation2 + $0x28] sm:$0xff] }
  0x11   :  { %346 = vmatmul.msk.f32.gmra.mxu0 %vm80_vm0, %v65_v3  ;;  %v60_v51 = vld [vmem:[#allocation2 + $0xe0] sm:$0xff]  ;;  %v49_v52 = vld [vmem:[#allocation2 + $0x88] sm:$0xff]  ;;  %v38_v53 = vld [vmem:[#allocation2 + $0x30] sm:$0xff] }
  0x12   :  { %v61_v54 = vld [vmem:[#allocation2 + $0xe8] sm:$0xff]  ;;  %v50_v55 = vld [vmem:[#allocation2 + $0x90] sm:$0xff]  ;;  %v39_v56 = vld [vmem:[#allocation2 + $0x38] sm:$0xff] }
  0x13   :  { %v62_v57 = vld [vmem:[#allocation2 + $0xf0] sm:$0xff]  ;;  %v51_v58 = vld [vmem:[#allocation2 + $0x98] sm:$0xff]  ;;  %v40_v59 = vld [vmem:[#allocation2 + $0x40] sm:$0xff] }
  0x14   :  { %v63_v60 = vld [vmem:[#allocation2 + $0xf8] sm:$0xff]  ;;  %v52_v61 = vld [vmem:[#allocation2 + $0xa0] sm:$0xff]  ;;  %v41_v62 = vld [vmem:[#allocation2 + $0x48] sm:$0xff] }
  0x15   :  { %v53_v63 = vld [vmem:[#allocation2 + $0xa8] sm:$0xff]  ;;  %v42_v0 = vld [vmem:[#allocation2 + $0x50] sm:$0xff] }
  0x16   :  { %v54_v1 = vld [vmem:[#allocation2 + $0xb0] sm:$0xff] }
  0x19   :  { %347 = vmatmul.msk.f32.gmra.mxu0 %vm80_vm0, %v66_v4 }
  0x21   :  { %348 = vmatmul.msk.f32.gmra.mxu0 %vm80_vm0, %v67_v5 }
  0x29   :  { %349 = vmatmul.msk.f32.gmra.mxu0 %vm80_vm0, %v68_v6 }
  0x31   :  { %350 = vmatmul.msk.f32.gmra.mxu0 %vm80_vm0, %v69_v7 }
  0x39   :  { %351 = vmatmul.msk.f32.gmra.mxu0 %vm80_vm0, %v70_v8 }
  0x41   :  { %352 = vmatmul.msk.f32.gmra.mxu0 %vm80_vm0, %v71_v9 }
  0x49   :  { %353 = vmatmul.msk.f32.gmra.mxu0 %vm80_vm0, %v72_v10 }
  0x51   :  { %354 = vmatmul.msk.f32.gmra.mxu0 %vm80_vm0, %v73_v11 }
  0x59   :  { %355 = vmatmul.msk.f32.gmra.mxu0 %vm80_vm0, %v74_v12 }
  0x61   :  { %356 = vmatmul.msk.f32.gmra.mxu0 %vm80_vm0, %v75_v13 }
  0x69   :  { %357 = vmatmul.msk.f32.gmra.mxu0 %vm80_vm0, %v76_v14 }
  0x71   :  { %358 = vmatmul.msk.f32.gmra.mxu0 %vm80_vm0, %v77_v15 }
  0x79   :  { %359 = vmatmul.msk.f32.gmra.mxu0 %vm80_vm0, %v78_v16 }
  0x81   :  { %360 = vmatmul.msk.f32.gmra.mxu0 %vm80_vm0, %v79_v17 }
  0x86   :  { %v518_v18 = vpop.f32.mrf.mxu0 }
  0x8e   :  { %v149_v19 = vpop.f32.mrf.mxu0 }
  0x96   :  { %v152_v20 = vpop.f32.mrf.mxu0 }
  0x9e   :  { %v155_v21 = vpop.f32.mrf.mxu0 }
  0xa6   :  { %v158_v22 = vpop.f32.mrf.mxu0 }
  0xae   :  { %v161_v23 = vpop.f32.mrf.mxu0 }
  0xb6   :  { %v164_v24 = vpop.f32.mrf.mxu0 }
  0xbe   :  { %v167_v25 = vpop.f32.mrf.mxu0 }
  0xc6   :  { %v170_v26 = vpop.f32.mrf.mxu0 }
  0xce   :  { %v173_v27 = vpop.f32.mrf.mxu0 }
  0xd6   :  { %v176_v28 = vpop.f32.mrf.mxu0 }
  0xde   :  { %v179_v29 = vpop.f32.mrf.mxu0 }
  0xe6   :  { %v182_v30 = vpop.f32.mrf.mxu0 }
  0xee   :  { %v185_v31 = vpop.f32.mrf.mxu0 }
  0xf6   :  { %v188_v32 = vpop.f32.mrf.mxu0 }
  0xfe   :  { %v191_v33 = vpop.f32.mrf.mxu0 }
  0xff   :  { %194 = vmatpush.msra.mxu1 %v191_v33  ;;  %361 = vmatpush.msra.mxu2 %v191_v33 }
 0x100   :  { %362 = vmatpush.msra.mxu3 %v191_v33 }
 0x101   :  { %195 = vmatpush.msra.mxu1 %v188_v32  ;;  %363 = vmatpush.msra.mxu2 %v188_v32 }
 0x102   :  { %364 = vmatpush.msra.mxu3 %v188_v32 }
 0x103   :  { %196 = vmatpush.msra.mxu1 %v185_v31  ;;  %365 = vmatpush.msra.mxu2 %v185_v31 }
 0x104   :  { %366 = vmatpush.msra.mxu3 %v185_v31 }
 0x105   :  { %197 = vmatpush.msra.mxu1 %v182_v30  ;;  %367 = vmatpush.msra.mxu2 %v182_v30 }
 0x106   :  { %368 = vmatpush.msra.mxu3 %v182_v30 }
 0x107   :  { %198 = vmatpush.msra.mxu1 %v179_v29  ;;  %369 = vmatpush.msra.mxu2 %v179_v29 }
 0x108   :  { %370 = vmatpush.msra.mxu3 %v179_v29 }
 0x109   :  { %199 = vmatpush.msra.mxu1 %v176_v28  ;;  %371 = vmatpush.msra.mxu2 %v176_v28 }
 0x10a   :  { %372 = vmatpush.msra.mxu3 %v176_v28 }
 0x10b   :  { %200 = vmatpush.msra.mxu1 %v173_v27  ;;  %373 = vmatpush.msra.mxu2 %v173_v27 }
 0x10c   :  { %374 = vmatpush.msra.mxu3 %v173_v27 }
 0x10d   :  { %201 = vmatpush.msra.mxu1 %v170_v26  ;;  %375 = vmatpush.msra.mxu2 %v170_v26 }
 0x10e   :  { %376 = vmatpush.msra.mxu3 %v170_v26 }
 0x10f   :  { %202 = vmatpush.msra.mxu1 %v167_v25  ;;  %377 = vmatpush.msra.mxu2 %v167_v25 }
 0x110   :  { %378 = vmatpush.msra.mxu3 %v167_v25 }
 0x111   :  { %203 = vmatpush.msra.mxu1 %v164_v24  ;;  %379 = vmatpush.msra.mxu2 %v164_v24 }
 0x112   :  { %380 = vmatpush.msra.mxu3 %v164_v24 }
 0x113   :  { %204 = vmatpush.msra.mxu1 %v161_v23  ;;  %381 = vmatpush.msra.mxu2 %v161_v23 }
 0x114   :  { %382 = vmatpush.msra.mxu3 %v161_v23 }
 0x115   :  { %205 = vmatpush.msra.mxu1 %v158_v22  ;;  %383 = vmatpush.msra.mxu2 %v158_v22 }
 0x116   :  { %384 = vmatpush.msra.mxu3 %v158_v22 }
 0x117   :  { %206 = vmatpush.msra.mxu1 %v155_v21  ;;  %385 = vmatpush.msra.mxu2 %v155_v21 }
 0x118   :  { %386 = vmatpush.msra.mxu3 %v155_v21 }
 0x119   :  { %207 = vmatpush.msra.mxu1 %v152_v20  ;;  %387 = vmatpush.msra.mxu2 %v152_v20 }
 0x11a   :  { %388 = vmatpush.msra.mxu3 %v152_v20 }
 0x11b   :  { %208 = vmatpush.msra.mxu1 %v149_v19  ;;  %389 = vmatpush.msra.mxu2 %v149_v19 }
 0x11c   :  { %390 = vmatpush.msra.mxu3 %v149_v19 }
 0x11d   :  { %209 = vmatpush.msra.mxu1 %v518_v18  ;;  %391 = vmatpush.msra.mxu2 %v518_v18 }
 0x11e   :  { %392 = vmatpush.msra.mxu3 %v518_v18  ;;  %243 = vmatmul.f32.vlgmr.msra.gmra.mxu2 %v43_v34 }
 0x11f   :  { %210 = vmatmul.f32.vlgmr.msra.gmra.mxu1 %v32_v35  ;;  %279 = vmatmul.f32.vlgmr.msra.gmra.mxu3 %v55_v36 }
 0x126   :  { %246 = vmatmul.f32.gmra.mxu2 %v44_v37 }
 0x127   :  { %213 = vmatmul.f32.gmra.mxu1 %v33_v38  ;;  %282 = vmatmul.f32.gmra.mxu3 %v56_v39 }
 0x12e   :  { %249 = vmatmul.f32.gmra.mxu2 %v45_v40 }
 0x12f   :  { %216 = vmatmul.f32.gmra.mxu1 %v34_v41  ;;  %285 = vmatmul.f32.gmra.mxu3 %v57_v42 }
 0x136   :  { %252 = vmatmul.f32.gmra.mxu2 %v46_v43 }
 0x137   :  { %219 = vmatmul.f32.gmra.mxu1 %v35_v44  ;;  %288 = vmatmul.f32.gmra.mxu3 %v58_v45 }
 0x13e   :  { %255 = vmatmul.f32.gmra.mxu2 %v47_v46 }
 0x13f   :  { %222 = vmatmul.f32.gmra.mxu1 %v36_v47  ;;  %291 = vmatmul.f32.gmra.mxu3 %v59_v48 }
 0x146   :  { %258 = vmatmul.f32.gmra.mxu2 %v48_v49 }
 0x147   :  { %225 = vmatmul.f32.gmra.mxu1 %v37_v50  ;;  %294 = vmatmul.f32.gmra.mxu3 %v60_v51 }
 0x14e   :  { %261 = vmatmul.f32.gmra.mxu2 %v49_v52 }
 0x14f   :  { %228 = vmatmul.f32.gmra.mxu1 %v38_v53  ;;  %297 = vmatmul.f32.gmra.mxu3 %v61_v54 }
 0x156   :  { %264 = vmatmul.f32.gmra.mxu2 %v50_v55 }
 0x157   :  { %231 = vmatmul.f32.gmra.mxu1 %v39_v56  ;;  %300 = vmatmul.f32.gmra.mxu3 %v62_v57 }
 0x15e   :  { %267 = vmatmul.f32.gmra.mxu2 %v51_v58 }
 0x15f   :  { %234 = vmatmul.f32.gmra.mxu1 %v40_v59  ;;  %303 = vmatmul.f32.gmra.mxu3 %v63_v60 }
 0x166   :  { %270 = vmatmul.f32.gmra.mxu2 %v52_v61 }
 0x167   :  { %237 = vmatmul.f32.gmra.mxu1 %v41_v62 }
 0x16e   :  { %273 = vmatmul.f32.gmra.mxu2 %v53_v63 }
 0x16f   :  { %240 = vmatmul.f32.gmra.mxu1 %v42_v0 }
 0x176   :  { %276 = vmatmul.f32.gmra.mxu2 %v54_v1 }
 0x19c   :  { %v211_v2 = vpop.f32.mrf.mxu1 }
 0x19d   :  { %308 = vst.msk [vmem:[%s654_s3] sm:$0xff] %vm307_vm1, %v211_v2 }
 0x1a1   :  { %v244_v3 = vpop.f32.mrf.mxu2 }
 0x1a2   :  { %319 = vst.msk [vmem:[%s654_s3 + $0x58] sm:$0xff] %vm307_vm1, %v244_v3  ;;  %v280_v4 = vpop.f32.mrf.mxu3 }
 0x1a3   :  { %331 = vst.msk [vmem:[%s654_s3 + $0xb8] sm:$0xff] %vm307_vm1, %v280_v4 }
 0x1a4   :  { %v214_v5 = vpop.f32.mrf.mxu1 }
 0x1a5   :  { %309 = vst.msk [vmem:[%s654_s3 + $0x8] sm:$0xff] %vm307_vm1, %v214_v5 }
 0x1a9   :  { %v247_v6 = vpop.f32.mrf.mxu2 }
 0x1aa   :  { %320 = vst.msk [vmem:[%s654_s3 + $0x60] sm:$0xff] %vm307_vm1, %v247_v6  ;;  %v283_v7 = vpop.f32.mrf.mxu3 }
 0x1ab   :  { %332 = vst.msk [vmem:[%s654_s3 + $0xc0] sm:$0xff] %vm307_vm1, %v283_v7 }
 0x1ac   :  { %v217_v8 = vpop.f32.mrf.mxu1 }
 0x1ad   :  { %310 = vst.msk [vmem:[%s654_s3 + $0x10] sm:$0xff] %vm307_vm1, %v217_v8 }
 0x1b1   :  { %v250_v9 = vpop.f32.mrf.mxu2 }
 0x1b2   :  { %321 = vst.msk [vmem:[%s654_s3 + $0x68] sm:$0xff] %vm307_vm1, %v250_v9  ;;  %v286_v10 = vpop.f32.mrf.mxu3 }
 0x1b3   :  { %333 = vst.msk [vmem:[%s654_s3 + $0xc8] sm:$0xff] %vm307_vm1, %v286_v10 }
 0x1b4   :  { %v220_v11 = vpop.f32.mrf.mxu1 }
 0x1b5   :  { %311 = vst.msk [vmem:[%s654_s3 + $0x18] sm:$0xff] %vm307_vm1, %v220_v11 }
 0x1b9   :  { %v253_v12 = vpop.f32.mrf.mxu2 }
 0x1ba   :  { %322 = vst.msk [vmem:[%s654_s3 + $0x70] sm:$0xff] %vm307_vm1, %v253_v12  ;;  %v289_v13 = vpop.f32.mrf.mxu3 }
 0x1bb   :  { %334 = vst.msk [vmem:[%s654_s3 + $0xd0] sm:$0xff] %vm307_vm1, %v289_v13 }
 0x1bc   :  { %v223_v14 = vpop.f32.mrf.mxu1 }
 0x1bd   :  { %312 = vst.msk [vmem:[%s654_s3 + $0x20] sm:$0xff] %vm307_vm1, %v223_v14 }
 0x1c1   :  { %v256_v15 = vpop.f32.mrf.mxu2 }
 0x1c2   :  { %323 = vst.msk [vmem:[%s654_s3 + $0x78] sm:$0xff] %vm307_vm1, %v256_v15  ;;  %v292_v16 = vpop.f32.mrf.mxu3 }
 0x1c3   :  { %335 = vst.msk [vmem:[%s654_s3 + $0xd8] sm:$0xff] %vm307_vm1, %v292_v16 }
 0x1c4   :  { %v226_v17 = vpop.f32.mrf.mxu1 }
 0x1c5   :  { %313 = vst.msk [vmem:[%s654_s3 + $0x28] sm:$0xff] %vm307_vm1, %v226_v17 }
 0x1c9   :  { %v259_v18 = vpop.f32.mrf.mxu2 }
 0x1ca   :  { %324 = vst.msk [vmem:[%s654_s3 + $0x80] sm:$0xff] %vm307_vm1, %v259_v18  ;;  %v295_v19 = vpop.f32.mrf.mxu3 }
 0x1cb   :  { %336 = vst.msk [vmem:[%s654_s3 + $0xe0] sm:$0xff] %vm307_vm1, %v295_v19 }
 0x1cc   :  { %v229_v20 = vpop.f32.mrf.mxu1 }
 0x1cd   :  { %314 = vst.msk [vmem:[%s654_s3 + $0x30] sm:$0xff] %vm307_vm1, %v229_v20 }
 0x1d1   :  { %v262_v21 = vpop.f32.mrf.mxu2 }
 0x1d2   :  { %325 = vst.msk [vmem:[%s654_s3 + $0x88] sm:$0xff] %vm307_vm1, %v262_v21  ;;  %v298_v22 = vpop.f32.mrf.mxu3 }
 0x1d3   :  { %337 = vst.msk [vmem:[%s654_s3 + $0xe8] sm:$0xff] %vm307_vm1, %v298_v22 }
 0x1d4   :  { %v232_v23 = vpop.f32.mrf.mxu1 }
 0x1d5   :  { %315 = vst.msk [vmem:[%s654_s3 + $0x38] sm:$0xff] %vm307_vm1, %v232_v23 }
 0x1d9   :  { %v265_v24 = vpop.f32.mrf.mxu2 }
 0x1da   :  { %326 = vst.msk [vmem:[%s654_s3 + $0x90] sm:$0xff] %vm307_vm1, %v265_v24  ;;  %v301_v25 = vpop.f32.mrf.mxu3 }
 0x1db   :  { %338 = vst.msk [vmem:[%s654_s3 + $0xf0] sm:$0xff] %vm307_vm1, %v301_v25 }
 0x1dc   :  { %v235_v26 = vpop.f32.mrf.mxu1 }
 0x1dd   :  { %316 = vst.msk [vmem:[%s654_s3 + $0x40] sm:$0xff] %vm307_vm1, %v235_v26 }
 0x1e1   :  { %v268_v27 = vpop.f32.mrf.mxu2 }
 0x1e2   :  { %327 = vst.msk [vmem:[%s654_s3 + $0x98] sm:$0xff] %vm307_vm1, %v268_v27  ;;  %v304_v28 = vpop.f32.mrf.mxu3 }
 0x1e3   :  { %339 = vst.msk [vmem:[%s654_s3 + $0xf8] sm:$0xff] %vm307_vm1, %v304_v28 }
 0x1e4   :  { %v238_v29 = vpop.f32.mrf.mxu1 }
 0x1e5   :  { %317 = vst.msk [vmem:[%s654_s3 + $0x48] sm:$0xff] %vm307_vm1, %v238_v29 }
 0x1e9   :  { %v271_v30 = vpop.f32.mrf.mxu2 }
 0x1ea   :  { %328 = vst.msk [vmem:[%s654_s3 + $0xa0] sm:$0xff] %vm307_vm1, %v271_v30 }
 0x1ec   :  { %v241_v31 = vpop.f32.mrf.mxu1 }
 0x1ed   :  { %318 = vst.msk [vmem:[%s654_s3 + $0x50] sm:$0xff] %vm307_vm1, %v241_v31 }
 0x1f1   :  { %v274_v32 = vpop.f32.mrf.mxu2 }
 0x1f2   :  { %329 = vst.msk [vmem:[%s654_s3 + $0xa8] sm:$0xff] %vm307_vm1, %v274_v32 }
 0x1f9   :  { %v277_v33 = vpop.f32.mrf.mxu2 }
 0x1fa   :  { %330 = vst.msk [vmem:[%s654_s3 + $0xb0] sm:$0xff] %vm307_vm1, %v277_v33 }
 0x1fb   :  { %344 = vsyncpa [#allocation3], 1 }

</bundles_post_ra>
